<compile_context>
chip_gen: v7x
topology: tpu7x:2x2x1
jax: 0.10.0
libtpu: 0.0.40
codegen_flags: <defaults>
</compile_context>

<pallas_src>
import jax
import jax.numpy as jnp
from jax.experimental import pallas as pl
from jax.experimental.pallas import tpu as pltpu

# Small, deterministic "image" extent (the test file defines W/H globally).
W = 16
H = 16

RGB_N = W * H * 3          # 768
ALPHA_N = W * H            # 256
TOTAL = RGB_N + ALPHA_N    # 1024 == 8 * 128  -> exactly one (8,128) f32 vreg

LANES = 128
ROWS = pl.cdiv(TOTAL, LANES)          # 8
PADDED = ROWS * LANES                 # 1024 (no padding needed at 16x16)


def _bits_to_uniform_f32(bits):
    """Uniform [0, 1) float32 from raw 32-bit random bits (mantissa trick)."""
    if bits.dtype != jnp.uint32:
        bits = jax.lax.bitcast_convert_type(bits, jnp.uint32)
    # Top 23 random bits -> mantissa of a float in [1, 2), then subtract 1.
    mant = (bits >> jnp.uint32(9)) | jnp.uint32(0x3F800000)
    return jax.lax.bitcast_convert_type(mant, jnp.float32) - jnp.float32(1.0)


def _rand_hw_kernel(seed_ref, out_ref):
    """TPU path: seed the HW PRNG, one draw, one fused (8,128) store."""
    # seed_ref: SMEM (1,) int32 ; out_ref: VMEM (8,128) float32
    pltpu.prng_seed(seed_ref[0])
    bits = pltpu.prng_random_bits(out_ref.shape)   # single draw for both outputs
    out_ref[...] = _bits_to_uniform_f32(bits)


def _rand_bits_kernel(bits_ref, out_ref):
    """Portable path: bits generated outside, kernel does bit-trick + store."""
    out_ref[...] = _bits_to_uniform_f32(bits_ref[...])


def mocked_gaussian_model_forward(seed: jnp.ndarray, **kwargs):
    """JAX/Pallas equivalent of MockedGaussianModel.forward.

    seed: int32 array of shape (1,).  Returns (rgb, alpha, {}) with
    rgb (1, W, H, 3) f32 in [0,1) and alpha (1, W, H, 1) f32 in [0,1).
    """
    out_shape = jax.ShapeDtypeStruct((ROWS, LANES), jnp.float32)

    if jax.default_backend() == "tpu":
        flat2d = pl.pallas_call(
            _rand_hw_kernel,
            out_shape=out_shape,
            in_specs=[pl.BlockSpec(memory_space=pltpu.SMEM)],
            cost_estimate=pl.CostEstimate(
                flops=4 * PADDED, transcendentals=0,
                bytes_accessed=4 * PADDED + 4),
        )(seed)
    else:
        # TODO(synk): pltpu.prng_seed/prng_random_bits have no CPU/interpret
        # lowering; off-TPU we feed jax.random bits into the same fused kernel.
        key = jax.random.PRNGKey(seed[0])
        bits = jax.random.bits(key, (ROWS, LANES), dtype=jnp.uint32)
        flat2d = pl.pallas_call(
            _rand_bits_kernel,
            out_shape=out_shape,
            cost_estimate=pl.CostEstimate(
                flops=4 * PADDED, transcendentals=0,
                bytes_accessed=8 * PADDED),
        )(bits)

    flat = flat2d.reshape(-1)
    rgb = flat[:RGB_N].reshape(1, W, H, 3)                 # (1, W, H, 3)
    alpha = flat[RGB_N:RGB_N + ALPHA_N].reshape(1, W, H, 1)  # (1, W, H, 1)
    return rgb, alpha, {}


if __name__ == "__main__":
    key = jax.random.PRNGKey(0)
    # The torch module takes no tensor inputs (forward(**kwargs) ignores them);
    # the only "input" is a deterministic PRNG seed.
    seed = jax.random.randint(key, (1,), 0, 2**31 - 1, dtype=jnp.int32)

    rgb, alpha, extras = mocked_gaussian_model_forward(seed)
    jax.block_until_ready((rgb, alpha))

    assert rgb.shape == (1, W, H, 3) and rgb.dtype == jnp.float32
    assert alpha.shape == (1, W, H, 1) and alpha.dtype == jnp.float32
    assert extras == {}
    assert bool(jnp.all((rgb >= 0.0) & (rgb < 1.0)))
    assert bool(jnp.all((alpha >= 0.0) & (alpha < 1.0)))

    print("KERNEL_OK")
</pallas_src>

<mosaic_0001>
module attributes {stable_mosaic.version = 11 : i64} {
  func.func @_rand_bits_kernel(%arg0: memref<8x128xi32, #tpu.memory_space<vmem>>, %arg1: memref<8x128xf32, #tpu.memory_space<vmem>>) attributes {dimension_semantics = [], scalar_prefetch = 0 : i64, scratch_operands = 0 : i64, tpu.core_type = #tpu.core_type<tc>} {
    %c0 = arith.constant 0 : index
    %c0_0 = arith.constant 0 : index
    %0 = vector.load %arg0[%c0, %c0_0] : memref<8x128xi32, #tpu.memory_space<vmem>>, vector<8x128xi32>
    %c9_i32 = arith.constant 9 : i32
    %1 = vector.broadcast %c9_i32 : i32 to vector<8x128xi32>
    %2 = arith.shrui %0, %1 : vector<8x128xi32>
    %c1065353216_i32 = arith.constant 1065353216 : i32
    %3 = vector.broadcast %c1065353216_i32 : i32 to vector<8x128xi32>
    %4 = arith.ori %2, %3 : vector<8x128xi32>
    %5 = tpu.bitcast %4 : vector<8x128xi32> -> vector<8x128xf32>
    %cst = arith.constant 1.000000e+00 : f32
    %6 = vector.broadcast %cst : f32 to vector<8x128xf32>
    %7 = arith.subf %5, %6 : vector<8x128xf32>
    %c0_1 = arith.constant 0 : index
    %c0_2 = arith.constant 0 : index
    %8 = vector.load %arg1[%c0_1, %c0_2] : memref<8x128xf32, #tpu.memory_space<vmem>>, vector<8x128xf32>
    tpu.vector_store %arg1[%c0_1, %c0_2], %7 {strides = array<i32>} : memref<8x128xf32, #tpu.memory_space<vmem>>, vector<8x128xf32>,
    return
  }
}

</mosaic_0001>

<bundles_post_ra>
// kernel: tpu_custom_call.1
= control target key start
LH: loop header
LB: loop body
LE: loop exit
PB: predicated region body
PF: predicated region fallthrough
CT: control target
= control target key end

     0   :  { %6 = vsyncpa [#allocation3], 0  ;;  %s129_s0 = inlined_call_operand.hbm [shape: u32[8,128], index: 0, kind: input, shape index: {}]   ;;  %s130_s1 = inlined_call_operand.hbm [shape: f32[8,128], index: 1, kind: output, shape index: {}]  }
   0x1   :  { %7 = vsyncpa [#allocation4], 0  ;;  %s93_s6 = smov [#allocation2]   ;;  %s45_s10 = scalar_lea.hbm %s129_s0, 128 }
   0x2   :  { %s14_s7 = sshll.u32 %s93_s6, 4  ;;  %p46_p0 = scmp.ne.s32.totalorder %s129_s0, %s45_s10  ;;  %s15_s7 = int_to_ptr.vmem [resolvable:$true] %s14_s7 }
   0x3   :  { %p49_p1 = scmp.lt.u32.totalorder %s45_s10, %s129_s0 }
   0x5   :  { %p51_p2 = pnand %p49_p1, %p46_p0 }
   0x7   :  { %54 = shalt.err (!%p51_p2)
}
   0x8   :  { %s55_s15 = scalar_lea.vmem %s15_s7, 128  ;;  %p60_p4 = scmp.lt.s32.totalorder %s15_s7, %s15_s7 }
   0x9   :  { %p56_p3 = scmp.ne.s32.totalorder %s15_s7, %s55_s15  ;;  %p61_p5 = scmp.lt.s32.totalorder %s55_s15, %s55_s15 }
   0xb   :  { %p62_p6 = por %p61_p5, %p60_p4 }
   0xd   :  { %p63_p7 = pnand %p62_p6, %p56_p3 }
   0xf   :  { %66 = shalt.err (!%p63_p7)
}
  0x10   :  { %17 = dma.hbm_to_vmem [thread:$0]  %s129_s0, 128, %s15_s7, [#allocation3]  }
  0x11   :  { %89 = dma.done.wait [#allocation3], 128  }
  0x12   :  { %90 = vsyncadd [#allocation3], 4294967168  ;;  %v21_v0 = vld [vmem:[#allocation2] sm:$0xff]  ;;  %s94_s18 = smov [#allocation5]  }
  0x13   :  { %v22_v1 = vshrl.u32 %v21_v0, 9  ;;  %s33_s19 = sshll.u32 %s94_s18, 4  ;;  %s34_s19 = int_to_ptr.vmem [resolvable:$true] %s33_s19 }
  0x14   :  { %s67_s20 = scalar_lea.vmem %s34_s19, 128  ;;  %p72_p9 = scmp.lt.s32.totalorder %s34_s19, %s34_s19 }
  0x15   :  { %v23_v2 = vor.u32 1065353216, %v22_v1  ;;  %p68_p8 = scmp.ne.s32.totalorder %s34_s19, %s67_s20  ;;  %p73_p10 = scmp.lt.s32.totalorder %s67_s20, %s67_s20 }
  0x17   :  { %v42_v3 = vadd.f32 -1.0, %v23_v2  ;;  %p74_p11 = por %p73_p10, %p72_p9 }
  0x19   :  { %26 = vst [vmem:[#allocation5] sm:$0xff] %v42_v3  ;;  %p75_p12 = pnand %p74_p11, %p68_p8 }
  0x1b   :  { %78 = shalt.err (!%p75_p12)
}
  0x1c   :  { %s79_s0 = scalar_lea.hbm %s130_s1, 128 }
  0x1d   :  { %p80_p13 = scmp.ne.s32.totalorder %s130_s1, %s79_s0  ;;  %p83_p0 = scmp.lt.u32.totalorder %s79_s0, %s130_s1 }
  0x1f   :  { %p85_p1 = pnand %p83_p0, %p80_p13 }
  0x21   :  { %88 = shalt.err (!%p85_p1)
}
  0x22   :  { %36 = dma.vmem_to_hbm [thread:$0]  %s34_s19, 128, %s130_s1, [#allocation4]  }
  0x23   :  { %91 = dma.done.wait [#allocation4], 128  }
  0x24   :  { %92 = vsyncadd [#allocation4], 4294967168 }
  0x25   :  { %40 = vsyncpa [#allocation3], 1 }
  0x26   :  { %41 = vsyncpa [#allocation4], 1 }

</bundles_post_ra>
